<compile_context>
chip_gen: v6e
topology: v6e:2x2x1
jax: 0.10.0
libtpu: 0.0.40
codegen_flags: <defaults>
</compile_context>

<pallas_src>
import jax
import jax.numpy as jnp
from jax.experimental import pallas as pl
from jax.experimental.pallas import tpu as pltpu


def _mlp_kernel(x_ref, w1t_ref, b1_ref, w2t_ref, b2_ref, w3t_ref, b3_ref, o_ref):
    x = x_ref[...]                                                        # (tb, D)
    # fc1 + relu   (dropout1 = identity in eval mode)
    h1 = jnp.dot(x, w1t_ref[...], preferred_element_type=jnp.float32) + b1_ref[...]
    h1 = jnp.maximum(h1, 0.0)                                             # (tb, 16) f32
    # fc2 + relu   (dropout2 = identity in eval mode); activations stay f32
    h2 = jnp.dot(h1, w2t_ref[...], preferred_element_type=jnp.float32) + b2_ref[...]
    h2 = jnp.maximum(h2, 0.0)                                             # (tb, 8) f32
    # fc3 + sigmoid (sigmoid -> EUP slot, which is idle)
    logits = jnp.dot(h2, w3t_ref[...], preferred_element_type=jnp.float32) + b3_ref[...]
    o_ref[...] = jax.nn.sigmoid(logits).astype(o_ref.dtype)              # (tb, 1)


def simple_nn_forward(x, params, *, block_b=65536, compute_dtype=jnp.bfloat16,
                      training=False):
    """Fused SimpleNN forward.

    x:       (B, input_dim) f32, consumed in natural layout (no wrapper transpose).
    params:  PyTorch-layout weights  W1 (16, D), b1 (16,), W2 (8, 16), b2 (8,),
             W3 (1, 8), b3 (1,).
    block_b: batch-tile rows per grid step (rounded to a multiple of 8 sublanes).
             Default 64K rows -> multi-MB x DMA per step (HBM-roofline regime).
    compute_dtype: streaming dtype for x / W1 (default bf16 -> halves HBM bytes);
             biases, activations, accumulation and output stay f32.
             Pass jnp.float32 for exact f32 semantics.
    """
    if training:
        # TODO(synk): implement Bernoulli dropout masks with pltpu.prng_seed/prng_random_bits.
        raise NotImplementedError("training-mode dropout not implemented; inference only")

    B, D = x.shape
    W1, b1 = params["W1"], params["b1"]
    W2, b2 = params["W2"], params["b2"]
    W3, b3 = params["W3"], params["b3"]

    # Stream x (and W1, so the first matmul is homogeneous) in compute_dtype.
    if compute_dtype is not None:
        x = x.astype(compute_dtype)
        W1 = W1.astype(compute_dtype)

    # Pre-transpose the (tiny, VMEM-resident) weights once; biases as broadcast rows.
    W1T = W1.T                       # (D, 16)
    W2T = W2.T.astype(jnp.float32)   # (16, 8)   kept f32 (negligible HBM cost)
    W3T = W3.T.astype(jnp.float32)   # (8, 1)
    b1r = b1.reshape(1, -1).astype(jnp.float32)   # (1, 16)
    b2r = b2.reshape(1, -1).astype(jnp.float32)   # (1, 8)
    b3r = b3.reshape(1, -1).astype(jnp.float32)   # (1, 1)

    # Batch tile: multiple of 8 sublanes, no bigger than the (rounded-up) batch.
    block_b = max(8, (int(block_b) // 8) * 8)
    tb = min(block_b, ((B + 7) // 8) * 8)
    n_steps = pl.cdiv(B, tb)
    b_pad = n_steps * tb
    if b_pad != B:
        # Contiguous row-append only (cheap); the transpose copy is gone entirely.
        x = jnp.pad(x, ((0, b_pad - B), (0, 0)))

    # VMEM budget: double-buffered x tile + f32 h1/h2 temporaries + output + slack.
    x_itemsize = jnp.dtype(x.dtype).itemsize
    x_tile_bytes = tb * D * x_itemsize
    act_bytes = tb * (16 + 8) * 4
    out_bytes = tb * 1 * 4
    budget = 2 * x_tile_bytes + act_bytes + 2 * out_bytes + (8 << 20)
    # >= 32 MiB so big tiles survive v5e's 16 MiB default; <= 58 MiB for v7x's 64 MiB TC.
    vmem_limit = int(min(max(budget, 32 << 20), 58 << 20))

    out = pl.pallas_call(
        _mlp_kernel,
        out_shape=jax.ShapeDtypeStruct((b_pad, 1), jnp.float32),
        grid_spec=pltpu.PrefetchScalarGridSpec(
            num_scalar_prefetch=0,
            grid=(n_steps,),
            in_specs=[
                pl.BlockSpec((tb, D), lambda i: (i, 0)),     # x tile, streamed, contiguous
                pl.BlockSpec((D, 16), lambda i: (0, 0)),     # W1^T, VMEM-resident
                pl.BlockSpec((1, 16), lambda i: (0, 0)),     # b1
                pl.BlockSpec((16, 8), lambda i: (0, 0)),     # W2^T
                pl.BlockSpec((1, 8), lambda i: (0, 0)),      # b2
                pl.BlockSpec((8, 1), lambda i: (0, 0)),      # W3^T
                pl.BlockSpec((1, 1), lambda i: (0, 0)),      # b3
            ],
            out_specs=pl.BlockSpec((tb, 1), lambda i: (i, 0)),
        ),
        compiler_params=pltpu.CompilerParams(
            dimension_semantics=("parallel",),               # megacore on v7x
            vmem_limit_bytes=vmem_limit,
        ),
    )(x, W1T, b1r, W2T, b2r, W3T, b3r)

    return out[:B]


def init_params(key, input_dim):
    """PyTorch nn.Linear default init (U[-1/sqrt(fan_in), +1/sqrt(fan_in)]),
    weights in PyTorch (out_features, in_features) layout, biases (out_features,)."""
    def linear(k, fan_in, fan_out):
        kw, kb = jax.random.split(k)
        bound = 1.0 / jnp.sqrt(fan_in)
        W = jax.random.uniform(kw, (fan_out, fan_in), jnp.float32, -bound, bound)
        b = jax.random.uniform(kb, (fan_out,), jnp.float32, -bound, bound)
        return W, b

    k1, k2, k3 = jax.random.split(key, 3)
    W1, b1 = linear(k1, input_dim, 16)
    W2, b2 = linear(k2, 16, 8)
    W3, b3 = linear(k3, 8, 1)
    return {"W1": W1, "b1": b1, "W2": W2, "b2": b2, "W3": W3, "b3": b3}


def reference_forward(x, p):
    h1 = jnp.maximum(x @ p["W1"].T + p["b1"], 0.0)
    h2 = jnp.maximum(h1 @ p["W2"].T + p["b2"], 0.0)
    return jax.nn.sigmoid(h2 @ p["W3"].T + p["b3"])


if __name__ == "__main__":
    key = jax.random.PRNGKey(0)
    kx, kp = jax.random.split(key)

    batch, input_dim = 8, 32
    x = jax.random.normal(kx, (batch, input_dim), dtype=jnp.float32)
    params = init_params(kp, input_dim)
    ref = reference_forward(x, params)

    # Exact-f32 path, single grid step (tile clamps to the tiny batch).
    out = jax.block_until_ready(simple_nn_forward(x, params, compute_dtype=jnp.float32))
    assert out.shape == (batch, 1)
    assert jnp.allclose(out, ref, atol=1e-5, rtol=1e-5)

    # Multi-step grid path (B not a multiple of the tile): exercises pipelined
    # batch tiling + the tail-pad slice.  f32 streaming, tight tolerance.
    kx2, _ = jax.random.split(kx)
    xb = jax.random.normal(kx2, (1000, input_dim), dtype=jnp.float32)
    refb = reference_forward(xb, params)
    outb = jax.block_until_ready(
        simple_nn_forward(xb, params, block_b=256, compute_dtype=jnp.float32))
    assert outb.shape == (1000, 1)
    assert jnp.allclose(outb, refb, atol=1e-5, rtol=1e-5)

    # Default path: bf16 streaming of x / W1 (activations & accumulation stay f32).
    # Expected error comes only from quantizing the inputs to bf16 (~1e-2 relative).
    outbf = jax.block_until_ready(simple_nn_forward(xb, params, block_b=256))
    assert outbf.shape == (1000, 1)
    assert jnp.allclose(outbf, refb, atol=5e-2, rtol=5e-2)

    print("KERNEL_OK")
</pallas_src>

<mosaic_0001>
module attributes {stable_mosaic.version = 11 : i64} {
  func.func @_mlp_kernel(%arg0: i32, %arg1: memref<8x32xf32, #tpu.memory_space<vmem>>, %arg2: memref<32x16xf32, #tpu.memory_space<vmem>>, %arg3: memref<1x16xf32, #tpu.memory_space<vmem>>, %arg4: memref<16x8xf32, #tpu.memory_space<vmem>>, %arg5: memref<1x8xf32, #tpu.memory_space<vmem>>, %arg6: memref<8x1xf32, #tpu.memory_space<vmem>>, %arg7: memref<1x1xf32, #tpu.memory_space<vmem>>, %arg8: memref<8x1xf32, #tpu.memory_space<vmem>>) attributes {dimension_semantics = [#tpu.dimension_semantics<parallel>], iteration_bounds = array<i64: 1>, scalar_prefetch = 0 : i64, scratch_operands = 0 : i64, tpu.core_type = #tpu.core_type<tc>, window_params = [{transform_indices = @transform_0, window_bounds = array<i64: 8, 32>}, {pipeline_mode = #tpu.pipeline_mode<synchronous>, transform_indices = @transform_1, window_bounds = array<i64: 32, 16>}, {pipeline_mode = #tpu.pipeline_mode<synchronous>, transform_indices = @transform_2, window_bounds = array<i64: 1, 16>}, {pipeline_mode = #tpu.pipeline_mode<synchronous>, transform_indices = @transform_3, window_bounds = array<i64: 16, 8>}, {pipeline_mode = #tpu.pipeline_mode<synchronous>, transform_indices = @transform_4, window_bounds = array<i64: 1, 8>}, {pipeline_mode = #tpu.pipeline_mode<synchronous>, transform_indices = @transform_5, window_bounds = array<i64: 8, 1>}, {pipeline_mode = #tpu.pipeline_mode<synchronous>, transform_indices = @transform_6, window_bounds = array<i64: 1, 1>}, {transform_indices = @transform_7, window_bounds = array<i64: 8, 1>}]} {
    %c0 = arith.constant 0 : index
    %c0_0 = arith.constant 0 : index
    %0 = vector.load %arg1[%c0, %c0_0] : memref<8x32xf32, #tpu.memory_space<vmem>>, vector<8x32xf32>
    %c0_1 = arith.constant 0 : index
    %c0_2 = arith.constant 0 : index
    %1 = vector.load %arg2[%c0_1, %c0_2] : memref<32x16xf32, #tpu.memory_space<vmem>>, vector<32x16xf32>
    %cst = arith.constant dense<0.000000e+00> : vector<8x16xf32>
    %2 = tpu.matmul %0, %1, %cst {dimension_numbers = #tpu.dot_dimension_numbers<[1], [0], [0], [1], [0, 0, 1, 1], [], []>} : vector<8x32xf32>, vector<32x16xf32>, vector<8x16xf32> -> vector<8x16xf32>
    %c0_3 = arith.constant 0 : index
    %c0_4 = arith.constant 0 : index
    %3 = vector.load %arg3[%c0_3, %c0_4] : memref<1x16xf32, #tpu.memory_space<vmem>>, vector<1x16xf32>
    %4 = vector.broadcast %3 : vector<1x16xf32> to vector<8x16xf32>
    %5 = arith.addf %2, %4 : vector<8x16xf32>
    %cst_5 = arith.constant 0.000000e+00 : f32
    %6 = vector.broadcast %cst_5 : f32 to vector<8x16xf32>
    %7 = arith.maximumf %5, %6 : vector<8x16xf32>
    %c0_6 = arith.constant 0 : index
    %c0_7 = arith.constant 0 : index
    %8 = vector.load %arg4[%c0_6, %c0_7] : memref<16x8xf32, #tpu.memory_space<vmem>>, vector<16x8xf32>
    %cst_8 = arith.constant dense<0.000000e+00> : vector<8x8xf32>
    %9 = tpu.matmul %7, %8, %cst_8 {dimension_numbers = #tpu.dot_dimension_numbers<[1], [0], [0], [1], [0, 0, 1, 1], [], []>} : vector<8x16xf32>, vector<16x8xf32>, vector<8x8xf32> -> vector<8x8xf32>
    %c0_9 = arith.constant 0 : index
    %c0_10 = arith.constant 0 : index
    %10 = vector.load %arg5[%c0_9, %c0_10] : memref<1x8xf32, #tpu.memory_space<vmem>>, vector<1x8xf32>
    %11 = vector.broadcast %10 : vector<1x8xf32> to vector<8x8xf32>
    %12 = arith.addf %9, %11 : vector<8x8xf32>
    %cst_11 = arith.constant 0.000000e+00 : f32
    %13 = vector.broadcast %cst_11 : f32 to vector<8x8xf32>
    %14 = arith.maximumf %12, %13 : vector<8x8xf32>
    %c0_12 = arith.constant 0 : index
    %c0_13 = arith.constant 0 : index
    %15 = vector.load %arg6[%c0_12, %c0_13] : memref<8x1xf32, #tpu.memory_space<vmem>>, vector<8x1xf32>
    %cst_14 = arith.constant dense<0.000000e+00> : vector<8x1xf32>
    %16 = tpu.matmul %14, %15, %cst_14 {dimension_numbers = #tpu.dot_dimension_numbers<[1], [0], [0], [1], [0, 0, 1, 1], [], []>} : vector<8x8xf32>, vector<8x1xf32>, vector<8x1xf32> -> vector<8x1xf32>
    %c0_15 = arith.constant 0 : index
    %c0_16 = arith.constant 0 : index
    %17 = vector.load %arg7[%c0_15, %c0_16] : memref<1x1xf32, #tpu.memory_space<vmem>>, vector<1x1xf32>
    %18 = vector.broadcast %17 : vector<1x1xf32> to vector<8x1xf32>
    %19 = arith.addf %16, %18 : vector<8x1xf32>
    %20 = arith.negf %19 : vector<8x1xf32>
    %21 = math.exp %20 : vector<8x1xf32>
    %cst_17 = arith.constant 1.000000e+00 : f32
    %22 = vector.broadcast %cst_17 : f32 to vector<8x1xf32>
    %23 = arith.addf %22, %21 : vector<8x1xf32>
    %24 = arith.divf %22, %23 : vector<8x1xf32>
    %c0_18 = arith.constant 0 : index
    %c0_19 = arith.constant 0 : index
    %25 = vector.load %arg8[%c0_18, %c0_19] : memref<8x1xf32, #tpu.memory_space<vmem>>, vector<8x1xf32>
    tpu.vector_store %arg8[%c0_18, %c0_19], %24 {strides = array<i32>} : memref<8x1xf32, #tpu.memory_space<vmem>>, vector<8x1xf32>,
    return
  }
  func.func @transform_0(%arg0: i32) -> (i32, i32) {
    %c0_i32 = arith.constant 0 : i32
    %c0_i32_0 = arith.constant 0 : i32
    return %arg0, %c0_i32 : i32, i32
  }
  func.func @transform_1(%arg0: i32) -> (i32, i32) {
    %c0_i32 = arith.constant 0 : i32
    %c0_i32_0 = arith.constant 0 : i32
    %c0_i32_1 = arith.constant 0 : i32
    return %c0_i32, %c0_i32_0 : i32, i32
  }
  func.func @transform_2(%arg0: i32) -> (i32, i32) {
    %c0_i32 = arith.constant 0 : i32
    %c0_i32_0 = arith.constant 0 : i32
    %c0_i32_1 = arith.constant 0 : i32
    return %c0_i32, %c0_i32_0 : i32, i32
  }
  func.func @transform_3(%arg0: i32) -> (i32, i32) {
    %c0_i32 = arith.constant 0 : i32
    %c0_i32_0 = arith.constant 0 : i32
    %c0_i32_1 = arith.constant 0 : i32
    return %c0_i32, %c0_i32_0 : i32, i32
  }
  func.func @transform_4(%arg0: i32) -> (i32, i32) {
    %c0_i32 = arith.constant 0 : i32
    %c0_i32_0 = arith.constant 0 : i32
    %c0_i32_1 = arith.constant 0 : i32
    return %c0_i32, %c0_i32_0 : i32, i32
  }
  func.func @transform_5(%arg0: i32) -> (i32, i32) {
    %c0_i32 = arith.constant 0 : i32
    %c0_i32_0 = arith.constant 0 : i32
    %c0_i32_1 = arith.constant 0 : i32
    return %c0_i32, %c0_i32_0 : i32, i32
  }
  func.func @transform_6(%arg0: i32) -> (i32, i32) {
    %c0_i32 = arith.constant 0 : i32
    %c0_i32_0 = arith.constant 0 : i32
    %c0_i32_1 = arith.constant 0 : i32
    return %c0_i32, %c0_i32_0 : i32, i32
  }
  func.func @transform_7(%arg0: i32) -> (i32, i32) {
    %c0_i32 = arith.constant 0 : i32
    %c0_i32_0 = arith.constant 0 : i32
    return %arg0, %c0_i32 : i32, i32
  }
}

</mosaic_0001>

<bundles_post_ra>
// kernel: tpu_custom_call.1
= control target key start
LH: loop header
LB: loop body
LE: loop exit
PB: predicated region body
PF: predicated region fallthrough
CT: control target
= control target key end

     0   :  { %v339_v0 = vmov 0.0   ;;  %vm340_vm0 = vmmov 0   ;;  %vm40_vm1 = vcmask 261120   ;;  %vm124_vm2 = vcmask 130048   ;;  %s420_s1 = inlined_call_operand.vmem [shape: f32[32,16], index: 1, kind: input, shape index: {}]   ;;  %s421_s0 = inlined_call_operand.vmem [shape: f32[8,32], index: 0, kind: input, shape index: {}]   ;;  %s422_s3 = inlined_call_operand.vmem [shape: f32[16,8], index: 3, kind: input, shape index: {}]   ;;  %s423_s2 = inlined_call_operand.vmem [shape: f32[1,16], index: 2, kind: input, shape index: {}]   ;;  %s424_s5 = inlined_call_operand.vmem [shape: f32[8,1], index: 5, kind: input, shape index: {}]   ;;  %s425_s6 = inlined_call_operand.<no memory space> [shape: f32[1,1], index: 6, kind: input, shape index: {}]   ;;  %s426_s4 = inlined_call_operand.vmem [shape: f32[1,8], index: 4, kind: input, shape index: {}]   ;;  %s427_s7 = inlined_call_operand.vmem [shape: f32[8,1], index: 7, kind: output, shape index: {}]  }
   0x1   :  { %310 = vmatprep.subr.mxu0 %v339_v0  ;;  %v32_v1 = vld [vmem:[%s420_s1 + $0x18] sm:$0xff]  ;;  %v31_v2 = vld [vmem:[%s420_s1 + $0x10] sm:$0xff]  ;;  %318 = vmatprep.mubr.msk.f32.mxu0 %vm340_vm0, %v339_v0  ;;  %v30_v3 = vld [vmem:[%s420_s1 + $0x8] sm:$0xff]  ;;  %v12_v14 = vstv %s425_s6  ;;  %vm207_vm3 = vcmask 64512   ;;  %vm287_vm4 = vcmask 7168  }
   0x2   :  { %311 = vmatpush3.msra.mxu0 %v32_v1  ;;  %321 = vmatprep.subr.mxu1 %v339_v0  ;;  %v29_v4 = vld [vmem:[%s420_s1] sm:$0xff]  ;;  %v116_v6 = vld [vmem:[%s422_s3 + $0x8] sm:$0xff]  ;;  %13 = vst [vmem:[#allocation2] sm:$0x1] %v12_v14 }
   0x3   :  { %312 = vmatprep.subr.mxu0 %v339_v0  ;;  %325 = vmatprep.mubr.msk.f32.mxu1 %vm340_vm0, %v339_v0  ;;  %v28_v5 = vld [vmem:[%s421_s0] sm:$0xff] }
   0x4   :  { %313 = vmatpush3.msra.mxu0 %v31_v2  ;;  %322 = vmatpush3.msra.mxu1 %v116_v6  ;;  %v115_v7 = vld [vmem:[%s422_s3] sm:$0xff] }
   0x5   :  { %314 = vmatprep.subr.mxu0 %v339_v0  ;;  %323 = vmatprep.subr.mxu1 %v339_v0  ;;  %v293_v8 = vld [vmem:[%s423_s2] ss:$0 sm:$0xff] }
   0x6   :  { %315 = vmatpush3.msra.mxu0 %v30_v3  ;;  %324 = vmatpush3.msra.mxu1 %v115_v7  ;;  %v199_v13 = vld [vmem:[%s424_s5] sm:$0xff] }
   0x7   :  { %316 = vmatprep.subr.mxu0 %v339_v0  ;;  %328 = vmatprep.subr.mxu1 %v339_v0  ;;  %v295_v15 = vld [vmem:[%s426_s4] ss:$0 sm:$0xff] }
   0x8   :  { %317 = vmatpush3.msra.mxu0 %v29_v4 }
   0x9   :  { %319 = vmatmul.mubr.msk.f32.vlgmr.msra.gmra.mxu0 %vm40_vm1, %v28_v5  ;;  %v297_v20 = vld [vmem:[#allocation2] ss:$0 sm:$0xff] }
  0xc9   :  { %v110_v9 = vpop.f32.mrf.mxu0 }
  0xca   :  { %v111_v10 = vadd.f32 %v293_v8, %v110_v9 }
  0xcb   :  { %v320_v11 = vpop.f32.mrf.mxu0 }
  0xcc   :  { %v114_v12 = vmax.f32 %v111_v10, 0.0 }
  0xce   :  { %326 = vmatmul.mubr.msk.f32.vlgmr.msra.gmra.mxu1 %vm124_vm2, %v114_v12 }
  0xcf   :  { %330 = vmatprep.mubr.msk.f32.mxu1 %vm340_vm0, %v339_v0  ;;  %329 = vmatpush3.msra.mxu1 %v199_v13 }
 0x18e   :  { %v194_v16 = vpop.f32.mrf.mxu1 }
 0x18f   :  { %v195_v17 = vadd.f32 %v295_v15, %v194_v16 }
 0x190   :  { %v327_v18 = vpop.f32.mrf.mxu1 }
 0x191   :  { %v198_v19 = vmax.f32 %v195_v17, 0.0 }
 0x193   :  { %331 = vmatmul.mubr.msk.f32.vlgmr.msra.gmra.mxu1 %vm207_vm3, %v198_v19 }
 0x253   :  { %v277_v21 = vpop.f32.mrf.mxu1 }
 0x254   :  { %v278_v22 = vadd.f32 %v297_v20, %v277_v21 }
 0x255   :  { %v332_v23 = vpop.f32.mrf.mxu1 }
 0x256   :  { %v299_v24 = vmul.f32 -1.442695, %v278_v22 }
 0x258   :  { %335 = vpow2.f32 %v299_v24 }
 0x265   :  { %v336_v25 = vpop.eup %335 }
 0x266   :  { %v284_v26 = vadd.f32 1.0, %v336_v25 }
 0x268   :  { %337 = vrcp.f32 %v284_v26 }
 0x275   :  { %v338_v27 = vpop.eup %337 }
 0x276   :  { %288 = vst.msk [vmem:[%s427_s7] sm:$0xff] %vm287_vm4, %v338_v27 }

</bundles_post_ra>
